<compile_context>
chip_gen: v5e
topology: v5e:2x2
jax: 0.10.0
libtpu: 0.0.40
codegen_flags: <defaults>
</compile_context>

<pallas_src>
import jax
import jax.numpy as jnp
from jax.experimental import pallas as pl
from jax.experimental.pallas import tpu as pltpu

_LANES = 128
_TARGET_BLOCK_BYTES = 4 * 1024 * 1024   # ~4 MiB per tile buffer
_MIN_SPLIT_BYTES = 512 * 1024           # only split a single-block case if each half >= 512 KiB
_VMEM_LIMIT_BYTES = 32 * 1024 * 1024    # safe on v5e/v6e (128 MiB phys) and v7x (64 MiB phys)


def _lecun_kernel(x_ref, o_ref):
    x = x_ref[...].astype(jnp.float32)
    o_ref[...] = (1.7159 * jnp.tanh(0.666 * x)).astype(o_ref.dtype)


def _sublane_multiple(dtype) -> int:
    # Minimum sublane tile: 8 for 32-bit, 16 for bf16, 32 for int8/fp8.
    itemsize = jnp.dtype(dtype).itemsize
    return max(8, 32 // max(itemsize, 1))


def _round_up(x: int, m: int) -> int:
    return ((x + m - 1) // m) * m


def lecun_forward(x):
    """Elementwise 1.7159 * tanh(0.666 * x) for any input shape, via Pallas."""
    orig_shape = x.shape
    dtype = x.dtype
    itemsize = jnp.dtype(dtype).itemsize

    flat = x.reshape(-1)
    n = flat.shape[0]
    if n == 0:
        return x

    # Lane-dense layout: (rows, 128). Only the <128-element tail is ever padded.
    rows = pl.cdiv(n, _LANES)
    padded = rows * _LANES
    if padded != n:
        flat = jnp.pad(flat, (0, padded - n))
    x2d = flat.reshape(rows, _LANES)

    sub = _sublane_multiple(dtype)
    max_block_rows = max(sub, (_TARGET_BLOCK_BYTES // (_LANES * itemsize)) // sub * sub)
    split_rows = max(sub, _MIN_SPLIT_BYTES // (_LANES * itemsize))

    if rows > max_block_rows:
        # Big input: big tiles; partial last block is masked by the pipeline.
        block_rows = max_block_rows
    elif rows >= 2 * split_rows:
        # Fits one block but is large: split into >=2 blocks so v7x's 2nd TC helps.
        block_rows = _round_up(pl.cdiv(rows, 2), sub)
    else:
        # Small input: one block equal to the full array dims (always a legal tile).
        block_rows = rows

    grid = (pl.cdiv(rows, block_rows),)

    out2d = pl.pallas_call(
        _lecun_kernel,
        out_shape=jax.ShapeDtypeStruct((rows, _LANES), dtype),
        grid_spec=pltpu.PrefetchScalarGridSpec(
            num_scalar_prefetch=0,
            grid=grid,
            in_specs=[pl.BlockSpec((block_rows, _LANES), lambda i: (i, 0))],
            out_specs=pl.BlockSpec((block_rows, _LANES), lambda i: (i, 0)),
        ),
        compiler_params=pltpu.CompilerParams(
            dimension_semantics=("parallel",),
            vmem_limit_bytes=_VMEM_LIMIT_BYTES,
        ),
        cost_estimate=pl.CostEstimate(
            flops=2 * n,
            transcendentals=n,
            bytes_accessed=2 * n * itemsize,
        ),
    )(x2d)

    out = out2d.reshape(-1)
    if padded != n:
        out = out[:n]
    return out.reshape(orig_shape)


def reference_forward(x):
    return (1.7159 * jnp.tanh(0.666 * x.astype(jnp.float32))).astype(x.dtype)


if __name__ == "__main__":
    key = jax.random.PRNGKey(0)
    k1, k2, k3 = jax.random.split(key, 3)

    # Small, lane-aligned case (2*4*16*16 = 2048 = 16 rows x 128 lanes exactly).
    x = jax.random.normal(k1, (2, 4, 16, 16), jnp.float32)
    out = jax.block_until_ready(lecun_forward(x))
    ref = reference_forward(x)
    assert out.shape == x.shape
    assert jnp.allclose(out, ref, rtol=1e-5, atol=1e-5), "mismatch (aligned f32)"

    # Ragged case (size not a multiple of 128) exercising the tail-pad path.
    x_odd = jax.random.normal(k2, (3, 7, 5), jnp.float32)
    out_odd = jax.block_until_ready(lecun_forward(x_odd))
    ref_odd = reference_forward(x_odd)
    assert out_odd.shape == x_odd.shape
    assert jnp.allclose(out_odd, ref_odd, rtol=1e-5, atol=1e-5), "mismatch (ragged f32)"

    # bf16 case exercising the dtype-aware (16,128) minimum tile.
    x_bf = jax.random.normal(k3, (4, 8, 64), jnp.float32).astype(jnp.bfloat16)
    out_bf = jax.block_until_ready(lecun_forward(x_bf))
    ref_bf = reference_forward(x_bf)
    assert out_bf.shape == x_bf.shape
    assert jnp.allclose(out_bf.astype(jnp.float32), ref_bf.astype(jnp.float32),
                        rtol=2e-2, atol=2e-2), "mismatch (bf16)"

    print("KERNEL_OK")
</pallas_src>

<mosaic_0001>
module attributes {stable_mosaic.version = 11 : i64} {
  func.func @_lecun_kernel(%arg0: i32, %arg1: memref<16x128xf32, #tpu.memory_space<vmem>>, %arg2: memref<16x128xf32, #tpu.memory_space<vmem>>) attributes {dimension_semantics = [#tpu.dimension_semantics<parallel>], iteration_bounds = array<i64: 1>, scalar_prefetch = 0 : i64, scratch_operands = 0 : i64, tpu.core_type = #tpu.core_type<tc>, window_params = [{transform_indices = @transform_0, window_bounds = array<i64: 16, 128>}, {transform_indices = @transform_1, window_bounds = array<i64: 16, 128>}]} {
    %c0 = arith.constant 0 : index
    %c0_0 = arith.constant 0 : index
    %0 = vector.load %arg1[%c0, %c0_0] : memref<16x128xf32, #tpu.memory_space<vmem>>, vector<16x128xf32>
    %cst = arith.constant 6.660000e-01 : f32
    %1 = vector.broadcast %cst : f32 to vector<16x128xf32>
    %2 = arith.mulf %1, %0 : vector<16x128xf32>
    %3 = math.tanh %2 : vector<16x128xf32>
    %cst_1 = arith.constant 1.715900e+00 : f32
    %4 = vector.broadcast %cst_1 : f32 to vector<16x128xf32>
    %5 = arith.mulf %4, %3 : vector<16x128xf32>
    %c0_2 = arith.constant 0 : index
    %c0_3 = arith.constant 0 : index
    %6 = vector.load %arg2[%c0_2, %c0_3] : memref<16x128xf32, #tpu.memory_space<vmem>>, vector<16x128xf32>
    tpu.vector_store %arg2[%c0_2, %c0_3], %5 {strides = array<i32>} : memref<16x128xf32, #tpu.memory_space<vmem>>, vector<16x128xf32>,
    return
  }
  func.func @transform_0(%arg0: i32) -> (i32, i32) {
    %c0_i32 = arith.constant 0 : i32
    %c0_i32_0 = arith.constant 0 : i32
    return %arg0, %c0_i32 : i32, i32
  }
  func.func @transform_1(%arg0: i32) -> (i32, i32) {
    %c0_i32 = arith.constant 0 : i32
    %c0_i32_0 = arith.constant 0 : i32
    return %arg0, %c0_i32 : i32, i32
  }
}

</mosaic_0001>

<bundles_post_ra>
// kernel: tpu_custom_call.1
= control target key start
LH: loop header
LB: loop body
LE: loop exit
PB: predicated region body
PF: predicated region fallthrough
CT: control target
= control target key end

     0   :  { %6 = vsyncpa [#allocation3], 0  ;;  %s134_s0 = inlined_call_operand.hbm [shape: f32[16,128], index: 0, kind: input, shape index: {}]   ;;  %s135_s1 = inlined_call_operand.hbm [shape: f32[16,128], index: 1, kind: output, shape index: {}]  }
   0x1   :  { %7 = vsyncpa [#allocation4], 0  ;;  %s12_s8 = sshll.u32 %s134_s0, 4  ;;  %s114_s9 = smov [#allocation2]   ;;  %s13_s8 = int_to_ptr.hbm [resolvable:$true] %s12_s8 }
   0x2   :  { %s14_s10 = sshll.u32 %s114_s9, 4  ;;  %s115_s11 = smov 128   ;;  %s15_s10 = int_to_ptr.vmem [resolvable:$true] %s14_s10 }
   0x3   :  { %s116_s12 = smov 8  }
   0x4   :  { %20 = dma.hbm_to_vmem [thread:$0]  %s13_s8, 256, %s15_s10, [#allocation3], %s115_s11, %s115_s11, %s116_s12  }
   0x5   :  { %110 = dma.done.wait [#allocation3], 256  }
   0x6   :  { %111 = vsyncadd [#allocation3], 4294967040  ;;  %v25_v0 = vld [vmem:[#allocation2] sm:$0xff]  ;;  %v26_v1 = vld [vmem:[#allocation2 + $0x8] sm:$0xff]  ;;  %s117_s13 = smov [#allocation5]   ;;  %s41_s0 = sshll.u32 %s135_s1, 4  ;;  %s42_s0 = int_to_ptr.hbm [resolvable:$true] %s41_s0 }
   0x7   :  { %v27_v2 = vmul.f32 0.666, %v25_v0  ;;  %v28_v3 = vmul.f32 0.666, %v26_v1  ;;  %s39_s14 = sshll.u32 %s117_s13, 4  ;;  %s40_s14 = int_to_ptr.vmem [resolvable:$true] %s39_s14 }
   0x9   :  { %58 = vtanh.f32 %v27_v2 }
   0xa   :  { %60 = vtanh.f32 %v28_v3 }
   0xf   :  { %v59_v4 = vpop.eup %58 }
  0x10   :  { %v61_v5 = vpop.eup %60  ;;  %v31_v6 = vmul.f32 1.7159, %v59_v4 }
  0x11   :  { %v32_v7 = vmul.f32 1.7159, %v61_v5 }
  0x12   :  { %33 = vst [vmem:[#allocation5] sm:$0xff] %v31_v6 }
  0x13   :  { %34 = vst [vmem:[#allocation5 + $0x8] sm:$0xff] %v32_v7 }
  0x14   :  { %47 = dma.vmem_to_hbm [thread:$0]  %s40_s14, 256, %s42_s0, [#allocation4], %s115_s11, %s115_s11, %s116_s12  }
  0x15   :  { %112 = dma.done.wait [#allocation4], 256  }
  0x16   :  { %113 = vsyncadd [#allocation4], 4294967040 }
  0x17   :  { %52 = vsyncpa [#allocation3], 1 }
  0x18   :  { %53 = vsyncpa [#allocation4], 1 }

</bundles_post_ra>
